<compile_context>
chip_gen: v7x
topology: tpu7x:2x2x1
jax: 0.10.0
libtpu: 0.0.40
codegen_flags: <defaults>
</compile_context>

<pallas_src>
import jax
import jax.numpy as jnp
from jax.experimental import pallas as pl
from jax.experimental.pallas import tpu as pltpu


def mul_conv1x1_kernel(x_ref, w_ref, o_ref):
    # x_ref: (1, C_in, ts), w_ref: (C_out, C_in), o_ref: (1, C_out, ts)
    o_ref[0] = jnp.dot(
        w_ref[...], x_ref[0], preferred_element_type=jnp.float32
    ).astype(o_ref.dtype)


def _pick_spatial_tile(hw, max_tile):
    """Largest multiple of 128 <= max_tile that divides hw (no padding needed).
    Falls back to a padded tiling if no such divisor exists."""
    best = None
    for t in range(128, min(max_tile, hw) + 1, 128):
        if hw % t == 0:
            best = t
    if best is not None:
        return best, hw
    ts = min(max_tile, pl.cdiv(hw, 128) * 128)
    return ts, pl.cdiv(hw, ts) * ts


def mul_conv1x1(x_nchw, scale_nc11, weight_oihw, *, max_tile=2048):
    """x_nchw: (N, C_in, H, W), scale_nc11: (1, C_in, 1, 1),
    weight_oihw: (C_out, C_in, 1, 1).  Returns (N, C_out, H, W)."""
    N, C_in, H, W = x_nchw.shape
    C_out = weight_oihw.shape[0]
    HW = H * W

    # Fold the per-channel scale into the weight: (x*s) @ W.T == x @ (diag(s)W).T
    # Done once in f32 on a (32, 64) tensor - negligible cost.
    w_scaled = weight_oihw.reshape(C_out, C_in) * scale_nc11.reshape(1, C_in)

    ts, HW_pad = _pick_spatial_tile(HW, max_tile)

    x_flat = x_nchw.reshape(N, C_in, HW)
    if HW_pad != HW:
        # Fallback only (e.g. HW not a multiple of 128); padding is tiny.
        x_flat = jnp.pad(x_flat, ((0, 0), (0, 0), (0, HW_pad - HW)))

    grid = (N, HW_pad // ts)

    out_flat = pl.pallas_call(
        mul_conv1x1_kernel,
        out_shape=jax.ShapeDtypeStruct((N, C_out, HW_pad), x_nchw.dtype),
        grid_spec=pltpu.PrefetchScalarGridSpec(
            num_scalar_prefetch=0,
            grid=grid,
            in_specs=[
                pl.BlockSpec((1, C_in, ts), lambda n, j: (n, 0, j)),
                # Constant index_map -> weight is DMA'd once and stays resident.
                pl.BlockSpec((C_out, C_in), lambda n, j: (0, 0)),
            ],
            out_specs=pl.BlockSpec((1, C_out, ts), lambda n, j: (n, 0, j)),
        ),
        compiler_params=pltpu.CompilerParams(
            # Both grid axes independent -> shard across v7x's 2 TCs; neutral
            # on v5e/v6e.  Double-buffered tiles at ts=2048 are ~1.5 MiB, so a
            # 32 MiB scoped VMEM limit is safe on every generation.
            dimension_semantics=("parallel", "parallel"),
            vmem_limit_bytes=32 * 1024 * 1024,
        ),
    )(x_flat, w_scaled)

    if HW_pad != HW:
        out_flat = out_flat[:, :, :HW]
    return out_flat.reshape(N, C_out, H, W)


if __name__ == "__main__":
    key = jax.random.PRNGKey(0)
    k1, k2, k3 = jax.random.split(key, 3)

    # Small shapes consistent with the module: channels fixed by Conv2d(64, 32, 1x1)
    N, C_in, C_out, H, W = 2, 64, 32, 16, 16

    x6 = jax.random.normal(k1, (N, C_in, H, W), dtype=jnp.float32)
    x11 = jax.random.normal(k2, (1, C_in, 1, 1), dtype=jnp.float32)
    # Deterministic conv weight (any deterministic init is fine for this test)
    weight = jax.random.normal(k3, (C_out, C_in, 1, 1), dtype=jnp.float32) * 0.05

    out = mul_conv1x1(x6, x11, weight)
    out = jax.block_until_ready(out)

    # Reference check in plain JAX
    ref = jnp.einsum("nchw,oc->nohw", x6 * x11, weight.reshape(C_out, C_in))
    assert out.shape == (N, C_out, H, W)
    assert jnp.allclose(out, ref, atol=1e-4, rtol=1e-4)

    print("KERNEL_OK")
</pallas_src>

<mosaic_0001>
module attributes {stable_mosaic.version = 11 : i64} {
  func.func @mul_conv1x1_kernel(%arg0: i32, %arg1: i32, %arg2: memref<1x64x256xf32, #tpu.memory_space<vmem>>, %arg3: memref<32x64xf32, #tpu.memory_space<vmem>>, %arg4: memref<1x32x256xf32, #tpu.memory_space<vmem>>) attributes {dimension_semantics = [#tpu.dimension_semantics<parallel>, #tpu.dimension_semantics<parallel>], iteration_bounds = array<i64: 2, 1>, scalar_prefetch = 0 : i64, scratch_operands = 0 : i64, tpu.core_type = #tpu.core_type<tc>, window_params = [{transform_indices = @transform_0, window_bounds = array<i64: 1, 64, 256>}, {pipeline_mode = #tpu.pipeline_mode<synchronous>, transform_indices = @transform_1, window_bounds = array<i64: 32, 64>}, {transform_indices = @transform_2, window_bounds = array<i64: 1, 32, 256>}]} {
    %c0 = arith.constant 0 : index
    %c0_0 = arith.constant 0 : index
    %0 = vector.load %arg3[%c0, %c0_0] : memref<32x64xf32, #tpu.memory_space<vmem>>, vector<32x64xf32>
    %c0_1 = arith.constant 0 : index
    %c0_2 = arith.constant 0 : index
    %c0_3 = arith.constant 0 : index
    %1 = vector.load %arg2[%c0_1, %c0_2, %c0_3] : memref<1x64x256xf32, #tpu.memory_space<vmem>>, vector<1x64x256xf32>
    %2 = vector.shape_cast %1 : vector<1x64x256xf32> to vector<64x256xf32>
    %cst = arith.constant dense<0.000000e+00> : vector<32x256xf32>
    %3 = tpu.matmul %0, %2, %cst {dimension_numbers = #tpu.dot_dimension_numbers<[1], [0], [0], [1], [0, 0, 1, 1], [], []>} : vector<32x64xf32>, vector<64x256xf32>, vector<32x256xf32> -> vector<32x256xf32>
    %c0_4 = arith.constant 0 : index
    %c0_5 = arith.constant 0 : index
    %c0_6 = arith.constant 0 : index
    %4 = vector.load %arg4[%c0_4, %c0_5, %c0_6] : memref<1x32x256xf32, #tpu.memory_space<vmem>>, vector<1x32x256xf32>
    %5 = vector.shape_cast %4 : vector<1x32x256xf32> to vector<32x256xf32>
    %6 = vector.shape_cast %3 : vector<32x256xf32> to vector<1x32x256xf32>
    tpu.vector_store %arg4[%c0_4, %c0_5, %c0_6], %6 {strides = array<i32>} : memref<1x32x256xf32, #tpu.memory_space<vmem>>, vector<1x32x256xf32>,
    return
  }
  func.func @transform_0(%arg0: i32, %arg1: i32) -> (i32, i32, i32) {
    %c0_i32 = arith.constant 0 : i32
    %c0_i32_0 = arith.constant 0 : i32
    return %arg0, %c0_i32, %arg1 : i32, i32, i32
  }
  func.func @transform_1(%arg0: i32, %arg1: i32) -> (i32, i32) {
    %c0_i32 = arith.constant 0 : i32
    %c0_i32_0 = arith.constant 0 : i32
    %c0_i32_1 = arith.constant 0 : i32
    return %c0_i32, %c0_i32_0 : i32, i32
  }
  func.func @transform_2(%arg0: i32, %arg1: i32) -> (i32, i32, i32) {
    %c0_i32 = arith.constant 0 : i32
    %c0_i32_0 = arith.constant 0 : i32
    return %arg0, %c0_i32, %arg1 : i32, i32, i32
  }
}

</mosaic_0001>

<bundles_post_ra>
// kernel: tpu_custom_call.1
= control target key start
LH: loop header
LB: loop body
LE: loop exit
PB: predicated region body
PF: predicated region fallthrough
CT: control target
= control target key end

     0   :  { %7 = vsyncpa [#allocation3], 0  ;;  %s976_s0 = inlined_call_operand.hbm [shape: f32[2,64,256], index: 0, kind: input, shape index: {}]   ;;  %s977_s1 = inlined_call_operand.hbm [shape: f32[32,64], index: 1, kind: input, shape index: {}]   ;;  %s978_s2 = inlined_call_operand.hbm [shape: f32[2,32,256], index: 2, kind: output, shape index: {}]  }
   0x1   :  { %9 = vsyncpa [#allocation3 + $0x1], 0 }
   0x2   :  { %10 = vsyncpa [#allocation6], 0 }
   0x3   :  { %11 = vsyncpa [#allocation4], 0 }
   0x4   :  { %13 = vsyncpa [#allocation4 + $0x1], 0  ;;  %s738_s9 = smov 0   ;;  %s740_s10 = smov 0  }
   0x5   :  { %s742_s11 = smov 0   ;;  %s744_s12 = smov 0  }
   0x6   :  { %s746_s13 = smov 0   ;;  %s748_s14 = smov 0  }
   0x7 LB: > { %s440_s15 = sadd.s32 4294967295, %s711_s14   ;;  %s441_s16 = sadd.s32 4294967294, %s711_s14   ;;  %s711_s14 = sphi %s748_s14, %s19_s14   ;;  %s707_s13 = sphi %s746_s13, %s1002_s13   ;;  %s703_s12 = sphi %s744_s12, %s1001_s12   ;;  %s699_s11 = sphi %s742_s11, %s1000_s11   ;;  %s695_s10 = sphi %s740_s10, %s999_s10   ;;  %s691_s9 = sphi %s738_s9, %s998_s9  }
   0x8   : > { %p53_p0 = scmp.ne.s32.totalorder %s695_s10, %s691_s9  ;;  %p772_p1 = scmp.eq.s32.totalorder %s440_s15, 0 }
   0x9   : > { %p776_p2 = scmp.eq.s32.totalorder %s440_s15, 1  ;;  %p106_p3 = scmp.eq.s32.totalorder %s441_s16, 1 }
   0xa   : > { %s983_s17 = scalar_select %p772_p1, 1, 0 }
   0xb   : > { %s984_s18 = scalar_select %p776_p2, 1, 0 }
   0xc   : > { %p782_p4 = por %p772_p1, %p53_p0  ;;  %p442_p5 = scmp.ge.s32.totalorder %s711_s14, 1 }
   0xd   : > { %p787_p6 = por %p106_p3, %p53_p0  ;;  %p113_p7 = scmp.lt.s32.totalorder %s711_s14, 3 }
   0xe   : > { %s985_s19 = scalar_select %p782_p4, 1, 0 }
   0xf   : > { %s986_s20 = scalar_select %p787_p6, 1, 0 }
  0x10   : > { %p792_p8 = pnand %p442_p5, %p113_p7  ;;  %s713_s22 = smov [#allocation5]  }
  0x11   : > { %s125_s23 = sshll.u32 %s713_s22, 4  ;;  %s31_s25 = sadd.s32 1, %s707_s13  ;;  %s126_s23 = int_to_ptr.vmem [resolvable:$true] %s125_s23 }
  0x12   : > { %s987_s21 = scalar_select %p792_p8, 1, 0 }
  0x13   : > { %p495_p9 = pneg %p792_p8  ;;  %s567_s28 = scalar_lea.hbm %s977_s1, 512 }
  0x14   : > { %p568_p12 = scmp.ne.s32.totalorder %s977_s1, %s567_s28  ;;  %p574_p5 = scmp.lt.u32.totalorder %s567_s28, %s977_s1 }
  0x15   : > { %p801_p11 = pnand %p495_p9, %p772_p1 }
  0x17   : > { %p569_p13 = pneg %p801_p11 }
  0x19   : > { %p570_p0 = pnand %p569_p13, %p568_p12 }
  0x1b   : > { %p571_p3 = pneg %p570_p0 }
  0x1d   : > { %p576_p7 = pnand %p574_p5, %p571_p3 }
  0x1f   : > { %579 = shalt.err (!%p576_p7)
}
  0x20   : > { %s580_s5 = scalar_lea.vmem %s126_s23, 512  ;;  %p588_p1 = scmp.lt.s32.totalorder %s126_s23, %s126_s23 }
  0x21   : > { %p581_p9 = scmp.ne.s32.totalorder %s126_s23, %s580_s5  ;;  %p589_p4 = scmp.lt.s32.totalorder %s580_s5, %s580_s5 }
  0x23   : > { %p583_p10 = pnand %p581_p9, %p569_p13  ;;  %p590_p8 = por %p589_p4, %p588_p1 }
  0x25   : > { %p584_p6 = pneg %p583_p10 }
  0x27   : > { %p591_p2 = pnand %p590_p8, %p584_p6 }
  0x29   : > { %594 = shalt.err (!%p591_p2)
}
  0x2a   : > { %s714_s6 = smov 128   ;;  %s715_s7 = smov 8  }
  0x2b   : > { %498 = dma.hbm_to_vmem [thread:$0]  (!%p801_p11), %s977_s1, 512, %s126_s23, [#allocation6], %s714_s6, %s714_s6, %s715_s7  }
  0x2c   : > { %p33_p1 = scmp.ge.s32.totalorder %s31_s25, 2  ;;  %s40_s16 = sadd.s32 1, %s699_s11 }
  0x2d   : > { %p47_p2 = scmp.ne.s32.totalorder %s699_s11, %s695_s10  ;;  %p48_p4 = scmp.eq.s32.totalorder %s711_s14, 0 }
  0x2e   : > { %s1004_s25 = smov (%p33_p1, %s31_s25), 0  ;;  %p990_p8 = scmp.ne.s32.totalorder %s984_s18, 0 }
  0x2f   : > { %p828_p6 = por %p48_p4, %p47_p2  ;;  %s35_s24 = ssub.s32 %s707_s13, %s1004_s25 }
  0x30   : > { %p834_p10 = por %p990_p8, %p47_p2  ;;  %p508_p12 = scmp.lt.s32.totalorder %s711_s14, 2 }
  0x31   : > { %p38_p11 = scmp.eq.s32.totalorder %s35_s24, 0  ;;  %s139_s23 = sand.u32 1, %s699_s11  }
  0x32   : > { %s445_s27 = sshll.u32 %s139_s23, 7  ;;  %s461_s29 = sshll.u32 %s707_s13, 11 }
  0x33   : > { %s843_s28 = scalar_select %p38_p11, %s699_s11, %s40_s16  }
  0x34   : > { %s849_s4 = scalar_lea.hbm %s976_s0, %s461_s29  ;;  %s143_s18 = scalar_lea.vmem [#allocation2], %s445_s27 }
  0x35   : > { %s152_s5 = sshll.u32 %s143_s18, 4  ;;  %p855_p13 = pnand %p508_p12, %p828_p6  ;;  %s851_s5 = int_to_ptr.vmem [resolvable:$true] %s152_s5 }
  0x36   : > { %s859_s7 = scalar_lea.sflag [#allocation3], %s139_s23  ;;  %s595_s8 = scalar_lea.hbm %s849_s4, 2048 }
  0x37   : > { %p596_p0 = scmp.ne.s32.totalorder %s849_s4, %s595_s8  ;;  %p597_p3 = pneg %p855_p13 }
  0x38   : > { %s600_s22 = scalar_lea.hbm %s976_s0, 4096  ;;  %p601_p9 = scmp.lt.u32.totalorder %s849_s4, %s976_s0 }
  0x39   : > { %p598_p5 = pnand %p597_p3, %p596_p0  ;;  %p602_p1 = scmp.lt.u32.totalorder %s600_s22, %s595_s8 }
  0x3a   : > { %p604_p4 = scmp.lt.u32.totalorder %s595_s8, %s849_s4 }
  0x3b   : > { %p599_p7 = pneg %p598_p5  ;;  %p603_p2 = por %p602_p1, %p601_p9 }
  0x3d   : > { %p605_p6 = por %p604_p4, %p603_p2 }
  0x3f   : > { %p606_p8 = pnand %p605_p6, %p599_p7 }
  0x41   : > { %609 = shalt.err (!%p606_p8)
}
  0x42   : > { %s610_s23 = scalar_lea.vmem %s851_s5, 2048  ;;  %s716_s29 = smov [#allocation2]  }
  0x43   : > { %p611_p12 = scmp.ne.s32.totalorder %s851_s5, %s610_s23  ;;  %s615_s30 = sshll.u32 %s716_s29, 4  ;;  %s616_s30 = int_to_ptr.vmem [resolvable:$false] %s615_s30 }
  0x44   : > { %s617_s3 = scalar_lea.vmem %s616_s30, 4096  ;;  %p618_p5 = scmp.lt.s32.totalorder %s851_s5, %s616_s30 }
  0x45   : > { %p613_p11 = pnand %p611_p12, %p597_p3  ;;  %p619_p9 = scmp.lt.s32.totalorder %s617_s3, %s610_s23 }
  0x47   : > { %p614_p0 = pneg %p613_p11  ;;  %p620_p1 = por %p619_p9, %p618_p5 }
  0x49   : > { %p621_p2 = pnand %p620_p1, %p614_p0 }
  0x4b   : > { %624 = shalt.err (!%p621_p2)
}
  0x4c   : > { %s717_s18 = smov 256   ;;  %s718_s8 = smov 16  }
  0x4d   : > { %502 = dma.hbm_to_vmem [thread:$0]  (!%p855_p13), %s849_s4, 2048, %s851_s5, %s859_s7, %s717_s18, %s717_s18, %s718_s8  }
  0x4e   : > { %p993_p3 = scmp.ne.s32.totalorder %s987_s21, 0 }
  0x4f   : > { %s890_s15 = sand.u32 (!%p993_p3), 1, %s695_s10   ;;  %p994_p7 = scmp.ne.s32.totalorder (!%p993_p3), %s985_s19, 0 }
  0x50   : > { %164 = sbr.rel (%p993_p3) target bundleno = 342 (0x156), region = 28  ;;  %s449_s16 = sshll.u32 (!%p993_p3), %s890_s15, 7 }
  0x51   : > { %s167_s22 = scalar_lea.sflag (!%p993_p3), [#allocation3], %s890_s15  ;;  %s894_s24 = scalar_lea.vmem (!%p993_p3), [#allocation2], %s449_s16 }
  0x57   : > { %678 = dma.done.wait (%p994_p7), %s167_s22, 2048  }
  0x58   : > { %680 = vsyncadd (%p994_p7), %s167_s22, 4294965248  ;;  %p995_p13 = scmp.ne.s32.totalorder %s983_s17, 0 }
  0x5a   : > { %682 = dma.done.wait (%p995_p13), [#allocation6], 512  }
  0x5b   : > { %684 = vsyncadd (%p995_p13), [#allocation6], 4294966784  ;;  %v719_v0 = vmov 0.0   ;;  %v202_v1 = vld [vmem:[%s894_s24 + $0x8] sm:$0xff]  ;;  %v204_v2 = vld [vmem:[%s894_s24 + $0x18] sm:$0xff]  ;;  %vm217_vm0 = vcmask 523264  }
  0x5c   : > { %294 = vmatprep.mubr.f32.mxu0 %v719_v0  ;;  %306 = vmatprep.mubr.f32.mxu1 %v719_v0  ;;  %v201_v3 = vld [vmem:[%s894_s24] sm:$0xff]  ;;  %v463_v4 = vpack.c.bf16 %v204_v2, %v202_v1  ;;  %v203_v5 = vld [vmem:[%s894_s24 + $0x10] sm:$0xff]  ;;  %v206_v6 = vld [vmem:[%s894_s24 + $0x28] sm:$0xff]  ;;  %s451_s17 = sshll.u32 %s890_s15, 6  ;;  %s462_s4 = sshll.u32 %s703_s12, 10 }
  0x5d   : > { %v208_v7 = vld [vmem:[%s894_s24 + $0x38] sm:$0xff]  ;;  %v465_v8 = vpack.c.bf16 %v203_v5, %v201_v3  ;;  %v205_v10 = vld [vmem:[%s894_s24 + $0x20] sm:$0xff]  ;;  %v207_v11 = vld [vmem:[%s894_s24 + $0x30] sm:$0xff]  ;;  %s194_s19 = scalar_lea.vmem [#allocation7], %s451_s17  ;;  %s927_s7 = scalar_lea.hbm %s978_s2, %s462_s4 }
  0x5e   : > { %v467_v9 = vpack.c.bf16 %v208_v7, %v206_v6  ;;  %v210_v12 = vld [vmem:[%s894_s24 + $0x48] sm:$0xff]  ;;  %464 = vmatprep.subr.bf16.mxu0 %v463_v4  ;;  %479 = vmatprep.subr.bf16.mxu1 %v463_v4  ;;  %v212_v13 = vld [vmem:[%s894_s24 + $0x58] sm:$0xff]  ;;  %v469_v14 = vpack.c.bf16 %v207_v11, %v205_v10  ;;  %v209_v16 = vld [vmem:[%s894_s24 + $0x40] sm:$0xff]  ;;  %s343_s21 = sshll.u32 %s194_s19, 4  ;;  %s328_s12 = scalar_lea.sflag [#allocation4], %s890_s15  ;;  %s922_s21 = int_to_ptr.vmem [resolvable:$true] %s343_s21 }
  0x5f   : > { %466 = vmatpush1.bf16.msra.mxu0 %v465_v8  ;;  %483 = vmatpush1.bf16.msra.mxu1 %v465_v8  ;;  %v471_v15 = vpack.c.bf16 %v212_v13, %v210_v12  ;;  %v211_v17 = vld [vmem:[%s894_s24 + $0x50] sm:$0xff]  ;;  %v214_v18 = vld [vmem:[%s894_s24 + $0x68] sm:$0xff]  ;;  %v216_v19 = vld [vmem:[%s894_s24 + $0x78] sm:$0xff]  ;;  %s625_s27 = scalar_lea.vmem %s922_s21, 1024  ;;  %s720_s23 = smov [#allocation7]  }
  0x60   : > { %468 = vmatprep.subr.bf16.mxu0 %v467_v9  ;;  %480 = vmatprep.subr.bf16.mxu1 %v467_v9  ;;  %v473_v20 = vpack.c.bf16 %v211_v17, %v209_v16  ;;  %v475_v21 = vpack.c.bf16 %v216_v19, %v214_v18  ;;  %v213_v22 = vld [vmem:[%s894_s24 + $0x60] sm:$0xff]  ;;  %v215_v23 = vld [vmem:[%s894_s24 + $0x70] sm:$0xff]  ;;  %v198_v27 = vld [vmem:[#allocation5 + $0x8] sm:$0xff]  ;;  %p626_p4 = scmp.ne.s32.totalorder %s922_s21, %s625_s27  ;;  %s629_s29 = sshll.u32 %s720_s23, 4  ;;  %s630_s29 = int_to_ptr.vmem [resolvable:$false] %s629_s29 }
  0x61   : > { %v477_v24 = vpack.c.bf16 %v215_v23, %v213_v22  ;;  %v197_v25 = vld [vmem:[#allocation5] sm:$0xff]  ;;  %v199_v26 = vld [vmem:[#allocation5 + $0x10] sm:$0xff]  ;;  %v200_v28 = vld [vmem:[#allocation5 + $0x18] sm:$0xff]  ;;  %s631_s30 = scalar_lea.vmem %s630_s29, 2048  ;;  %p632_p12 = scmp.lt.s32.totalorder %s922_s21, %s630_s29 }
  0x62   : > { %p627_p6 = pnand %p626_p4, %p834_p10  ;;  %p633_p11 = scmp.lt.s32.totalorder %s631_s30, %s625_s27 }
  0x63   : > { %470 = vmatpush1.bf16.msra.mxu0 %v469_v14  ;;  %484 = vmatpush1.bf16.msra.mxu1 %v469_v14 }
  0x64   : > { %472 = vmatprep.subr.bf16.mxu0 %v471_v15  ;;  %481 = vmatprep.subr.bf16.mxu1 %v471_v15  ;;  %p628_p8 = pneg %p627_p6  ;;  %p634_p0 = por %p633_p11, %p632_p12 }
  0x66   : > { %p635_p5 = pnand %p634_p0, %p628_p8 }
  0x67   : > { %474 = vmatpush1.bf16.msra.mxu0 %v473_v20  ;;  %485 = vmatpush1.bf16.msra.mxu1 %v473_v20 }
  0x68   : > { %476 = vmatprep.subr.bf16.mxu0 %v475_v21  ;;  %482 = vmatprep.subr.bf16.mxu1 %v475_v21 }
  0x6b   : > { %478 = vmatpush1.bf16.msra.mxu0 %v477_v24  ;;  %486 = vmatpush1.bf16.msra.mxu1 %v477_v24 }
  0x6e   : > { %452 = vmatmul.mubr.msk.f32.vlgmr.msra.gmra.mrb[0].mxu0 %vm217_vm0, %v197_v25  ;;  %454 = vmatmul.mubr.msk.f32.vlgmr.msra.gmra.mrb[0].mxu1 %vm217_vm0, %v199_v26 }
  0x6f   : > { %300 = vmatprep.mubr.f32.mxu0 %v719_v0  ;;  %312 = vmatprep.mubr.f32.mxu1 %v719_v0 }
  0x72   : > { %453 = vmatmul.mubr.msk.f32.gmra.mrb[2].mxu0 %vm217_vm0, %v198_v27  ;;  %455 = vmatmul.mubr.msk.f32.gmra.mrb[2].mxu1 %vm217_vm0, %v200_v28 }
 0x141   : > { %v296_v29 = vpop.f32.mrb[0].mxu0  ;;  %v308_v30 = vpop.f32.mrb[0].mxu1 }
 0x142   : > { %319 = vst [vmem:[%s194_s19] sm:$0xff] %v296_v29  ;;  %323 = vst [vmem:[%s194_s19 + $0x20] sm:$0xff] %v308_v30  ;;  %v298_v31 = vpop.f32.mrb[1].mxu0  ;;  %v310_v32 = vpop.f32.mrb[1].mxu1 }
 0x143   : > { %320 = vst [vmem:[%s194_s19 + $0x8] sm:$0xff] %v298_v31  ;;  %324 = vst [vmem:[%s194_s19 + $0x28] sm:$0xff] %v310_v32 }
 0x145   : > { %v302_v33 = vpop.f32.mrb[2].mxu0  ;;  %v314_v34 = vpop.f32.mrb[2].mxu1 }
 0x146   : > { %321 = vst [vmem:[%s194_s19 + $0x10] sm:$0xff] %v302_v33  ;;  %325 = vst [vmem:[%s194_s19 + $0x30] sm:$0xff] %v314_v34  ;;  %v304_v35 = vpop.f32.mrb[3].mxu0  ;;  %v316_v36 = vpop.f32.mrb[3].mxu1 }
 0x147   : > { %322 = vst [vmem:[%s194_s19 + $0x18] sm:$0xff] %v304_v35  ;;  %326 = vst [vmem:[%s194_s19 + $0x38] sm:$0xff] %v316_v36 }
 0x148   : > { %638 = shalt.err (!%p635_p5)
}
 0x149   : > { %s639_s3 = scalar_lea.hbm %s927_s7, 1024  ;;  %s643_s16 = scalar_lea.hbm %s978_s2, 2048 }
 0x14a   : > { %p640_p9 = scmp.ne.s32.totalorder %s927_s7, %s639_s3  ;;  %p644_p3 = scmp.lt.u32.totalorder %s927_s7, %s978_s2 }
 0x14b   : > { %p645_p7 = scmp.lt.u32.totalorder %s643_s16, %s639_s3  ;;  %p647_p4 = scmp.lt.u32.totalorder %s639_s3, %s927_s7 }
 0x14c   : > { %p641_p1 = pnand %p640_p9, %p834_p10 }
 0x14d   : > { %p646_p13 = por %p645_p7, %p644_p3 }
 0x14e   : > { %p642_p2 = pneg %p641_p1 }
 0x14f   : > { %p648_p6 = por %p647_p4, %p646_p13 }
 0x151   : > { %p649_p8 = pnand %p648_p6, %p642_p2 }
 0x153   : > { %652 = shalt.err (!%p649_p8)
}
 0x154   : > { %s721_s17 = smov 256   ;;  %s722_s19 = smov 16  }
 0x155   : > { %493 = dma.vmem_to_hbm [thread:$0]  (%p834_p10), %s922_s21, 1024, %s927_s7, %s328_s12, %s721_s17, %s721_s17, %s722_s19  }
 0x156 PF: > { %s358_s4 = sand.u32 1, %s691_s9   ;;  %p996_p12 = scmp.ne.s32.totalorder %s986_s20, 0 }
 0x157   : > { %p997_p11 = scmp.ge.s32.totalorder %s711_s14, 2  ;;  %s359_s5 = scalar_lea.sflag [#allocation4], %s358_s4 }
 0x159   : > { %p504_p0 = pnand %p997_p11, %p996_p12 }
 0x15b   : > { %686 = dma.done.wait (!%p504_p0), %s359_s5, 1024  }
 0x15c   : > { %688 = vsyncadd (!%p504_p0), %s359_s5, 4294966272  ;;  %s19_s14 = sadd.s32 1, %s711_s14   ;;  %s998_s9 = smov %s695_s10 }
 0x15d   : > { %p16_p5 = scmp.ge.s32.totalorder %s19_s14, 4   ;;  %s999_s10 = smov %s699_s11 }
 0x15e   : > { %s1000_s11 = smov %s843_s28  ;;  %s1001_s12 = smov %s707_s13 }
 0x15f   : > { %s1002_s13 = smov %s1004_s25  ;;  %18 = sbr.rel (!%p16_p5) target bundleno = 7 (0x7), region = 77 }
 0x166   :  { %364 = vsyncpa [#allocation3], 1 }
 0x167   :  { %366 = vsyncpa [#allocation3 + $0x1], 1 }
 0x168   :  { %367 = vsyncpa [#allocation6], 1 }
 0x169   :  { %368 = vsyncpa [#allocation4], 1 }
 0x16a   :  { %370 = vsyncpa [#allocation4 + $0x1], 1 }

</bundles_post_ra>
